<compile_context>
chip_gen: v6e
topology: v6e:2x2x1
jax: 0.10.0
libtpu: 0.0.40
codegen_flags: <defaults>
</compile_context>

<pallas_src>
import functools

import jax
import jax.numpy as jnp
from jax import lax
from jax.experimental import pallas as pl
from jax.experimental.pallas import tpu as pltpu


def _semantic_grouping_kernel(x_ref, slots_ref, dots_ref, slots_out_ref, *,
                              temp, eps, block_b):
    # x_ref:         (block_b, D, N)   channel-major, spatial flattened on lanes
    # slots_ref:     (K, D)            prototype embeddings (shared across batch)
    # dots_ref:      (block_b, K, N)   cosine-similarity map (pre-softmax)
    # slots_out_ref: (block_b, K, D)   updated slots
    inv_temp = 1.0 / temp  # compile-time constant; multiply instead of divide

    # Normalise the (shared) slots once per grid step.
    # F.normalize(v, eps=1e-12) == v * rsqrt(max(sum(v^2), 1e-24))
    s = slots_ref[...]                                                  # (K, D)
    s_inv = lax.rsqrt(jnp.maximum(jnp.sum(s * s, axis=1, keepdims=True), 1e-24))
    sn = s * s_inv                                                      # (K, D)

    for bi in range(block_b):  # static unroll over the batch block
        x = x_ref[bi]                                                   # (D, N)

        # normalise x over the channel axis (sublane reduction)
        x_inv = lax.rsqrt(
            jnp.maximum(jnp.sum(x * x, axis=0, keepdims=True), 1e-24))  # (1, N)
        xn = x * x_inv                                                  # (D, N)

        # dots[k, n] = sum_d sn[k, d] * xn[d, n]     (MXU)
        dots = lax.dot_general(sn, xn, (((1,), (0,)), ((), ())),
                               preferred_element_type=jnp.float32)      # (K, N)
        dots_ref[bi] = dots                                             # lane-dense store

        # softmax over the slot axis K (sublanes), then + eps
        z = dots * inv_temp
        e = jnp.exp(z - jnp.max(z, axis=0, keepdims=True))              # (K, N)
        attn = e * (1.0 / jnp.sum(e, axis=0, keepdims=True)) + eps      # (K, N)

        # normalise attention over the spatial axis (lane reduction)
        attn_w = attn * (1.0 / jnp.sum(attn, axis=1, keepdims=True))    # (K, N)

        # slots_out[k, d] = sum_n attn_w[k, n] * x[d, n]   (MXU, contract N;
        # note: uses the *un-normalised* x, matching x_prev in PyTorch)
        slots_out_ref[bi] = lax.dot_general(
            attn_w, x, (((1,), (1,)), ((), ())),
            preferred_element_type=jnp.float32)                         # (K, D)


def _pick_block_b(B):
    # Largest batch block <= 8 that divides B while keeping >= 2 grid steps,
    # so both TensorCores of a multi-TC chip (v7x) still get work.
    for cand in (8, 4, 2):
        if B % cand == 0 and (B // cand) >= 2:
            return cand
    return 1


def semantic_grouping(x_nchw, slot_embed, temp=0.07, eps=1e-6, block_b=None):
    """x_nchw: (B, D, H, W) float32; slot_embed: (K, D) float32.

    Returns (slots, dots) with slots (B, K, D) and dots (B, K, H, W),
    matching the PyTorch module's outputs.
    """
    B, D, H, W = x_nchw.shape
    K, D2 = slot_embed.shape
    assert D == D2
    N = H * W

    if block_b is None:
        block_b = _pick_block_b(B)
    assert B % block_b == 0

    # Free reshape (no data movement): NCHW -> (B, D, N).
    x_bdn = x_nchw.reshape(B, D, N)

    kernel = functools.partial(_semantic_grouping_kernel,
                               temp=temp, eps=eps, block_b=block_b)

    # TODO(synk): for production SlotCon resolutions (large N = H*W) add an
    # N-tiling grid axis that accumulates the slots numerator / denominator in
    # VMEM scratch (pl.when epilogue), so a full (D, N) slab never needs to fit
    # VMEM (important for v7x's 64 MiB VMEM).
    dots_bkn, slots_bkd = pl.pallas_call(
        kernel,
        out_shape=(
            jax.ShapeDtypeStruct((B, K, N), jnp.float32),
            jax.ShapeDtypeStruct((B, K, D), jnp.float32),
        ),
        grid_spec=pltpu.PrefetchScalarGridSpec(
            num_scalar_prefetch=0,
            grid=(B // block_b,),
            in_specs=[
                pl.BlockSpec((block_b, D, N), lambda b: (b, 0, 0)),  # x block
                pl.BlockSpec((K, D), lambda b: (0, 0)),              # shared slots
            ],
            out_specs=[
                pl.BlockSpec((block_b, K, N), lambda b: (b, 0, 0)),
                pl.BlockSpec((block_b, K, D), lambda b: (b, 0, 0)),
            ],
        ),
        compiler_params=pltpu.CompilerParams(
            dimension_semantics=("parallel",)),
    )(x_bdn, slot_embed)

    # Free reshape: (B, K, N) -> (B, K, H, W) (matches PyTorch bkhw dots).
    return slots_bkd, dots_bkn.reshape(B, K, H, W)


def _reference(x_nchw, slot_embed, temp=0.07, eps=1e-6):
    """Pure-JAX reference mirroring the PyTorch forward exactly."""
    B = x_nchw.shape[0]
    slots = jnp.broadcast_to(slot_embed[None], (B,) + slot_embed.shape)  # (B,K,D)

    def l2n(v, axis):
        n = jnp.sqrt(jnp.sum(v * v, axis=axis, keepdims=True))
        return v / jnp.maximum(n, 1e-12)

    dots = jnp.einsum("bkd,bdhw->bkhw", l2n(slots, 2), l2n(x_nchw, 1))
    attn = jax.nn.softmax(dots / temp, axis=1) + eps
    attn_n = attn / jnp.sum(attn, axis=(2, 3), keepdims=True)
    slots_new = jnp.einsum("bdhw,bkhw->bkd", x_nchw, attn_n)
    return slots_new, dots


if __name__ == "__main__":
    # Small shapes consistent with the module: B=2, D=32 channels, 16x16 spatial, K=8 slots.
    B, D, H, W, K = 2, 32, 16, 16, 8

    key = jax.random.PRNGKey(0)
    kx, ks = jax.random.split(key)
    x = jax.random.normal(kx, (B, D, H, W), dtype=jnp.float32)
    # nn.Embedding default init: N(0, 1)
    slot_embed = jax.random.normal(ks, (K, D), dtype=jnp.float32)

    slots_out, dots_out = semantic_grouping(x, slot_embed)
    jax.block_until_ready((slots_out, dots_out))

    slots_ref, dots_ref = _reference(x, slot_embed)
    assert slots_out.shape == (B, K, D)
    assert dots_out.shape == (B, K, H, W)
    # Tolerances deliberately account for lax.rsqrt (EUP) normalisation vs the
    # reference's sqrt+divide, plus TPU matmul rounding.
    assert jnp.allclose(dots_out, dots_ref, rtol=2e-3, atol=1e-3)
    assert jnp.allclose(slots_out, slots_ref, rtol=2e-3, atol=1e-3)

    print("KERNEL_OK")
</pallas_src>

<mosaic_0001>
module attributes {stable_mosaic.version = 11 : i64} {
  func.func @_semantic_grouping_kernel(%arg0: i32, %arg1: memref<1x32x256xf32, #tpu.memory_space<vmem>>, %arg2: memref<8x32xf32, #tpu.memory_space<vmem>>, %arg3: memref<1x8x256xf32, #tpu.memory_space<vmem>>, %arg4: memref<1x8x32xf32, #tpu.memory_space<vmem>>) attributes {dimension_semantics = [#tpu.dimension_semantics<parallel>], iteration_bounds = array<i64: 2>, scalar_prefetch = 0 : i64, scratch_operands = 0 : i64, tpu.core_type = #tpu.core_type<tc>, window_params = [{transform_indices = @transform_0, window_bounds = array<i64: 1, 32, 256>}, {pipeline_mode = #tpu.pipeline_mode<synchronous>, transform_indices = @transform_1, window_bounds = array<i64: 8, 32>}, {transform_indices = @transform_2, window_bounds = array<i64: 1, 8, 256>}, {transform_indices = @transform_3, window_bounds = array<i64: 1, 8, 32>}]} {
    %c0 = arith.constant 0 : index
    %c0_0 = arith.constant 0 : index
    %0 = vector.load %arg2[%c0, %c0_0] : memref<8x32xf32, #tpu.memory_space<vmem>>, vector<8x32xf32>
    %1 = arith.mulf %0, %0 : vector<8x32xf32>
    %cst = arith.constant dense<0.000000e+00> : vector<8xf32>
    %2 = vector.multi_reduction <add>, %1, %cst [1] : vector<8x32xf32> to vector<8xf32>
    %3 = vector.shape_cast %2 : vector<8xf32> to vector<8x1xf32>
    %cst_1 = arith.constant 1.000000e-24 : f32
    %4 = vector.broadcast %cst_1 : f32 to vector<8x1xf32>
    %5 = arith.maximumf %3, %4 : vector<8x1xf32>
    %6 = math.rsqrt %5 : vector<8x1xf32>
    %7 = vector.broadcast %6 : vector<8x1xf32> to vector<8x32xf32>
    %8 = arith.mulf %0, %7 : vector<8x32xf32>
    %c0_2 = arith.constant 0 : index
    %c0_3 = arith.constant 0 : index
    %c0_4 = arith.constant 0 : index
    %9 = vector.load %arg1[%c0_2, %c0_3, %c0_4] : memref<1x32x256xf32, #tpu.memory_space<vmem>>, vector<1x32x256xf32>
    %10 = vector.shape_cast %9 : vector<1x32x256xf32> to vector<32x256xf32>
    %11 = arith.mulf %10, %10 : vector<32x256xf32>
    %cst_5 = arith.constant dense<0.000000e+00> : vector<256xf32>
    %12 = vector.multi_reduction <add>, %11, %cst_5 [0] : vector<32x256xf32> to vector<256xf32>
    %13 = vector.shape_cast %12 : vector<256xf32> to vector<1x256xf32>
    %cst_6 = arith.constant 1.000000e-24 : f32
    %14 = vector.broadcast %cst_6 : f32 to vector<1x256xf32>
    %15 = arith.maximumf %13, %14 : vector<1x256xf32>
    %16 = math.rsqrt %15 : vector<1x256xf32>
    %17 = vector.broadcast %16 : vector<1x256xf32> to vector<32x256xf32>
    %18 = arith.mulf %10, %17 : vector<32x256xf32>
    %cst_7 = arith.constant dense<0.000000e+00> : vector<8x256xf32>
    %19 = tpu.matmul %8, %18, %cst_7 {dimension_numbers = #tpu.dot_dimension_numbers<[1], [0], [0], [1], [0, 0, 1, 1], [], []>} : vector<8x32xf32>, vector<32x256xf32>, vector<8x256xf32> -> vector<8x256xf32>
    %c0_8 = arith.constant 0 : index
    %c0_9 = arith.constant 0 : index
    %c0_10 = arith.constant 0 : index
    %20 = vector.load %arg3[%c0_8, %c0_9, %c0_10] : memref<1x8x256xf32, #tpu.memory_space<vmem>>, vector<1x8x256xf32>
    %21 = vector.shape_cast %20 : vector<1x8x256xf32> to vector<8x256xf32>
    %22 = vector.shape_cast %19 : vector<8x256xf32> to vector<1x8x256xf32>
    tpu.vector_store %arg3[%c0_8, %c0_9, %c0_10], %22 {strides = array<i32>} : memref<1x8x256xf32, #tpu.memory_space<vmem>>, vector<1x8x256xf32>,
    %cst_11 = arith.constant 14.2857141 : f32
    %23 = vector.broadcast %cst_11 : f32 to vector<8x256xf32>
    %24 = arith.mulf %19, %23 : vector<8x256xf32>
    %cst_12 = arith.constant dense<0xFF800000> : vector<256xf32>
    %25 = vector.multi_reduction <maximumf>, %24, %cst_12 [0] : vector<8x256xf32> to vector<256xf32>
    %26 = vector.shape_cast %25 : vector<256xf32> to vector<1x256xf32>
    %27 = vector.broadcast %26 : vector<1x256xf32> to vector<8x256xf32>
    %28 = arith.subf %24, %27 : vector<8x256xf32>
    %29 = math.exp %28 : vector<8x256xf32>
    %cst_13 = arith.constant dense<0.000000e+00> : vector<256xf32>
    %30 = vector.multi_reduction <add>, %29, %cst_13 [0] : vector<8x256xf32> to vector<256xf32>
    %31 = vector.shape_cast %30 : vector<256xf32> to vector<1x256xf32>
    %cst_14 = arith.constant 1.000000e+00 : f32
    %32 = vector.broadcast %cst_14 : f32 to vector<1x256xf32>
    %33 = arith.divf %32, %31 : vector<1x256xf32>
    %34 = vector.broadcast %33 : vector<1x256xf32> to vector<8x256xf32>
    %35 = arith.mulf %29, %34 : vector<8x256xf32>
    %cst_15 = arith.constant 9.99999997E-7 : f32
    %36 = vector.broadcast %cst_15 : f32 to vector<8x256xf32>
    %37 = arith.addf %35, %36 : vector<8x256xf32>
    %cst_16 = arith.constant dense<0.000000e+00> : vector<8xf32>
    %38 = vector.multi_reduction <add>, %37, %cst_16 [1] : vector<8x256xf32> to vector<8xf32>
    %39 = vector.shape_cast %38 : vector<8xf32> to vector<8x1xf32>
    %cst_17 = arith.constant 1.000000e+00 : f32
    %40 = vector.broadcast %cst_17 : f32 to vector<8x1xf32>
    %41 = arith.divf %40, %39 : vector<8x1xf32>
    %42 = vector.broadcast %41 : vector<8x1xf32> to vector<8x256xf32>
    %43 = arith.mulf %37, %42 : vector<8x256xf32>
    %cst_18 = arith.constant dense<0.000000e+00> : vector<8x32xf32>
    %44 = tpu.matmul %43, %10, %cst_18 {dimension_numbers = #tpu.dot_dimension_numbers<[1], [1], [0], [0], [0, 0, 1, 0], [], []>} : vector<8x256xf32>, vector<32x256xf32>, vector<8x32xf32> -> vector<8x32xf32>
    %c0_19 = arith.constant 0 : index
    %c0_20 = arith.constant 0 : index
    %c0_21 = arith.constant 0 : index
    %45 = vector.load %arg4[%c0_19, %c0_20, %c0_21] : memref<1x8x32xf32, #tpu.memory_space<vmem>>, vector<1x8x32xf32>
    %46 = vector.shape_cast %45 : vector<1x8x32xf32> to vector<8x32xf32>
    %47 = vector.shape_cast %44 : vector<8x32xf32> to vector<1x8x32xf32>
    tpu.vector_store %arg4[%c0_19, %c0_20, %c0_21], %47 {strides = array<i32>} : memref<1x8x32xf32, #tpu.memory_space<vmem>>, vector<1x8x32xf32>,
    return
  }
  func.func @transform_0(%arg0: i32) -> (i32, i32, i32) {
    %c0_i32 = arith.constant 0 : i32
    %c0_i32_0 = arith.constant 0 : i32
    %c0_i32_1 = arith.constant 0 : i32
    return %arg0, %c0_i32, %c0_i32_0 : i32, i32, i32
  }
  func.func @transform_1(%arg0: i32) -> (i32, i32) {
    %c0_i32 = arith.constant 0 : i32
    %c0_i32_0 = arith.constant 0 : i32
    %c0_i32_1 = arith.constant 0 : i32
    return %c0_i32, %c0_i32_0 : i32, i32
  }
  func.func @transform_2(%arg0: i32) -> (i32, i32, i32) {
    %c0_i32 = arith.constant 0 : i32
    %c0_i32_0 = arith.constant 0 : i32
    %c0_i32_1 = arith.constant 0 : i32
    return %arg0, %c0_i32, %c0_i32_0 : i32, i32, i32
  }
  func.func @transform_3(%arg0: i32) -> (i32, i32, i32) {
    %c0_i32 = arith.constant 0 : i32
    %c0_i32_0 = arith.constant 0 : i32
    %c0_i32_1 = arith.constant 0 : i32
    return %arg0, %c0_i32, %c0_i32_0 : i32, i32, i32
  }
}

</mosaic_0001>

<bundles_post_ra>
// kernel: tpu_custom_call.1
= control target key start
LH: loop header
LB: loop body
LE: loop exit
PB: predicated region body
PF: predicated region fallthrough
CT: control target
= control target key end

     0   :  { %9 = vsyncpa [#allocation3], 0  ;;  %s1102_s0 = inlined_call_operand.hbm [shape: f32[2,32,256], index: 0, kind: input, shape index: {}]   ;;  %s1103_s1 = inlined_call_operand.hbm [shape: f32[8,32], index: 1, kind: input, shape index: {}]   ;;  %s1104_s2 = inlined_call_operand.hbm [shape: f32[2,8,256], index: 2, kind: output, shape index: {0}]   ;;  %s1105_s3 = inlined_call_operand.hbm [shape: f32[2,8,32], index: 3, kind: output, shape index: {1}]  }
   0x1   :  { %11 = vsyncpa [#allocation3 + $0x1], 0 }
   0x2   :  { %12 = vsyncpa [#allocation6], 0 }
   0x3   :  { %13 = vsyncpa [#allocation4], 0 }
   0x4   :  { %15 = vsyncpa [#allocation4 + $0x1], 0 }
   0x5   :  { %16 = vsyncpa [#allocation9], 0 }
   0x6   :  { %18 = vsyncpa [#allocation9 + $0x1], 0  ;;  %s891_s12 = smov 0   ;;  %s893_s13 = smov 0  }
   0x7   :  { %s895_s14 = smov 0   ;;  %s897_s15 = smov 0  }
   0x8 LB: > { %s912_s16 = sadd.s32 4294967295, %s862_s15   ;;  %s607_s17 = sadd.s32 4294967294, %s862_s15   ;;  %s862_s15 = sphi %s897_s15, %s1128_s15   ;;  %s858_s14 = sphi %s895_s14, %s1127_s14   ;;  %s854_s13 = sphi %s893_s13, %s1126_s13   ;;  %s850_s12 = sphi %s891_s12, %s1125_s12  }
   0x9   : > { %s916_s18 = sadd.s32 1, %s862_s15   ;;  %s31_s19 = sadd.s32 1, %s858_s14 }
   0xa   : > { %s28_s20 = ssub.s32 %s862_s15, %s916_s18  ;;  %p38_p0 = scmp.ne.s32.totalorder %s858_s14, %s854_s13 }
   0xb   : > { %p29_p1 = scmp.eq.s32.totalorder %s28_s20, 0  ;;  %p39_p2 = scmp.eq.s32.totalorder %s862_s15, 0 }
   0xc   : > { %p44_p3 = scmp.ne.s32.totalorder %s854_s13, %s850_s12  ;;  %p1106_p4 = scmp.eq.s32.totalorder %s912_s16, 0 }
   0xd   : > { %s928_s21 = scalar_select %p29_p1, %s858_s14, %s31_s19  }
   0xe   : > { %p930_p5 = por %p39_p2, %p38_p0  ;;  %p936_p6 = por %p1106_p4, %p44_p3 }
   0xf   : > { %p89_p7 = scmp.eq.s32.totalorder %s912_s16, 1  ;;  %p95_p8 = scmp.eq.s32.totalorder %s607_s17, 1 }
  0x10   : > { %s1111_s23 = scalar_select %p936_p6, 1, 0 }
  0x11   : > { %p608_p9 = scmp.ge.s32.totalorder %s862_s15, 1  ;;  %p128_p10 = scmp.lt.s32.totalorder %s862_s15, 3 }
  0x12   : > { %p943_p11 = por %p89_p7, %p38_p0  ;;  %p947_p12 = por %p95_p8, %p44_p3 }
  0x13   : > { %p951_p13 = pnand %p608_p9, %p128_p10  ;;  %s864_s27 = smov [#allocation5]  }
  0x14   : > { %s1112_s24 = scalar_select %p943_p11, 1, 0 }
  0x15   : > { %s1113_s25 = scalar_select %p947_p12, 1, 0 }
  0x16   : > { %s1114_s26 = scalar_select %p951_p13, 1, 0 }
  0x17   : > { %p639_p2 = pneg %p951_p13  ;;  %s141_s28 = sshll.u32 %s864_s27, 4  ;;  %s142_s28 = int_to_ptr.vmem [resolvable:$true] %s141_s28 }
  0x18   : > { %p655_p4 = scmp.lt.s32.totalorder %s862_s15, 2  ;;  %p1115_p0 = scmp.eq.s32.totalorder %s912_s16, 0 }
  0x19   : > { %s152_s30 = sand.u32 1, %s858_s14   ;;  %s721_s6 = scalar_lea.vmem %s142_s28, 128 }
  0x1a   : > { %p961_p7 = pnand %p639_p2, %p1115_p0  ;;  %p968_p3 = pnand %p655_p4, %p930_p5 }
  0x1b   : > { %s611_s5 = sshll.u32 %s152_s30, 6  ;;  %p722_p9 = scmp.ne.s32.totalorder %s142_s28, %s721_s6 }
  0x1c   : > { %p712_p8 = pneg %p961_p7  ;;  %p729_p12 = scmp.lt.s32.totalorder %s142_s28, %s142_s28 }
  0x1d   : > { %p730_p11 = scmp.lt.s32.totalorder %s721_s6, %s721_s6 }
  0x1e   : > { %p724_p10 = pnand %p722_p9, %p712_p8 }
  0x1f   : > { %p731_p2 = por %p730_p11, %p729_p12 }
  0x20   : > { %p725_p1 = pneg %p724_p10 }
  0x22   : > { %p732_p0 = pnand %p731_p2, %p725_p1 }
  0x24   : > { %735 = shalt.err (!%p732_p0)
}
  0x25   : > { %642 = dma.hbm_to_vmem [thread:$0]  (!%p961_p7), %s1103_s1, 128, %s142_s28, [#allocation6]  }
  0x26   : > { %s627_s9 = sshll.u32 %s862_s15, 10  ;;  %s156_s10 = scalar_lea.vmem [#allocation2], %s611_s5 }
  0x27   : > { %s163_s11 = sshll.u32 %s156_s10, 4  ;;  %s983_s20 = scalar_lea.hbm %s1102_s0, %s627_s9  ;;  %s985_s11 = int_to_ptr.vmem [resolvable:$true] %s163_s11 }
  0x28   : > { %s987_s22 = scalar_lea.sflag [#allocation3], %s152_s30  ;;  %s736_s27 = scalar_lea.hbm %s983_s20, 1024 }
  0x29   : > { %p737_p4 = scmp.ne.s32.totalorder %s983_s20, %s736_s27  ;;  %p738_p5 = pneg %p968_p3 }
  0x2a   : > { %s741_s5 = scalar_lea.hbm %s1102_s0, 2048  ;;  %p742_p1 = scmp.lt.s32.totalorder %s983_s20, %s1102_s0 }
  0x2b   : > { %p739_p11 = pnand %p738_p5, %p737_p4  ;;  %p743_p7 = scmp.lt.s32.totalorder %s741_s5, %s736_s27 }
  0x2d   : > { %p740_p12 = pneg %p739_p11  ;;  %p744_p8 = por %p743_p7, %p742_p1 }
  0x2f   : > { %p745_p9 = pnand %p744_p8, %p740_p12 }
  0x31   : > { %748 = shalt.err (!%p745_p9)
}
  0x32   : > { %s749_s30 = scalar_lea.vmem %s985_s11, 1024  ;;  %s865_s8 = smov [#allocation2]  }
  0x33   : > { %p750_p10 = scmp.ne.s32.totalorder %s985_s11, %s749_s30  ;;  %s754_s9 = sshll.u32 %s865_s8, 4  ;;  %s755_s9 = int_to_ptr.vmem [resolvable:$false] %s754_s9 }
  0x34   : > { %s756_s10 = scalar_lea.vmem %s755_s9, 2048  ;;  %p757_p4 = scmp.lt.s32.totalorder %s985_s11, %s755_s9 }
  0x35   : > { %p752_p2 = pnand %p750_p10, %p738_p5  ;;  %p758_p11 = scmp.lt.s32.totalorder %s756_s10, %s749_s30 }
  0x37   : > { %p753_p0 = pneg %p752_p2  ;;  %p759_p6 = por %p758_p11, %p757_p4 }
  0x39   : > { %p760_p13 = pnand %p759_p6, %p753_p0 }
  0x3b   : > { %763 = shalt.err (!%p760_p13)
}
  0x3c   : > { %s866_s17 = smov 256   ;;  %s867_s19 = smov 16  }
  0x3d   : > { %646 = dma.hbm_to_vmem [thread:$0]  (!%p968_p3), %s983_s20, 1024, %s985_s11, %s987_s22, %s866_s17, %s866_s17, %s867_s19  }
  0x3e   : > { %p1118_p5 = scmp.ne.s32.totalorder %s1114_s26, 0 }
  0x3f   : > { %s1011_s27 = sand.u32 (!%p1118_p5), 1, %s854_s13   ;;  %p1119_p6 = scmp.ne.s32.totalorder (!%p1118_p5), %s1111_s23, 0 }
  0x40   : > { %175 = sbr.rel (%p1118_p5) target bundleno = 854 (0x356), region = 28  ;;  %s615_s28 = sshll.u32 (!%p1118_p5), %s1011_s27, 6 }
  0x41   : > { %s178_s29 = scalar_lea.sflag (!%p1118_p5), [#allocation3], %s1011_s27  ;;  %s181_s5 = scalar_lea.vmem (!%p1118_p5), [#allocation2], %s615_s28 }
  0x45   : > { %833 = dma.done.wait (%p1119_p6), %s178_s29, 1024  }
  0x46   : > { %835 = vsyncadd (%p1119_p6), %s178_s29, 4294966272  ;;  %p1120_p13 = scmp.eq.s32.totalorder %s912_s16, 0 }
  0x48   : > { %837 = dma.done.wait (%p1120_p13), [#allocation6], 128   ;;  %p1121_p3 = pmov %p1120_p13 }
  0x49   : > { %v1023_v0 = vld [vmem:[#allocation5] sm:$0xff]  ;;  %vm215_vm0 = vcmask 261120   ;;  %v223_v1 = vld [vmem:[%s181_s5 + $0x8] sm:$0xff]  ;;  %v225_v2 = vld [vmem:[%s181_s5 + $0x18] sm:$0xff]  ;;  %v868_v34 = vmov 0.0   ;;  %s617_s23 = sshll.u32 %s1011_s27, 4 }
  0x4a   : > { %839 = vsyncadd (%p1121_p3), [#allocation6], 4294967168  ;;  %v214_v3 = vmul.f32 %v1023_v0, %v1023_v0  ;;  %v227_v4 = vld [vmem:[%s181_s5 + $0x28] sm:$0xff]  ;;  %v229_v5 = vld [vmem:[%s181_s5 + $0x38] sm:$0xff]  ;;  %v231_v6 = vmul.f32 %v223_v1, %v223_v1  ;;  %v233_v7 = vmul.f32 %v225_v2, %v225_v2  ;;  %335 = vmatprep.mubr.f32.mxu0 %v868_v34  ;;  %s1031_s26 = scalar_lea.vmem [#allocation7], %s617_s23  ;;  %s628_s11 = sshll.u32 %s912_s16, 8 }
  0x4b   : > { %v222_v8 = vld [vmem:[%s181_s5] sm:$0xff]  ;;  %v235_v9 = vmul.f32 %v227_v4, %v227_v4  ;;  %v237_v10 = vmul.f32 %v229_v5, %v229_v5  ;;  %v224_v11 = vld [vmem:[%s181_s5 + $0x10] sm:$0xff]  ;;  %415 = vmatprep.subr.mxu1 %v229_v5  ;;  %s482_s4 = sshll.u32 %s1031_s26, 4  ;;  %s480_s6 = scalar_lea.hbm %s1104_s2, %s628_s11  ;;  %s483_s4 = int_to_ptr.vmem [resolvable:$true] %s482_s4 }
  0x4c   : > { %v226_v12 = vld [vmem:[%s181_s5 + $0x20] sm:$0xff]  ;;  %v228_v13 = vld [vmem:[%s181_s5 + $0x30] sm:$0xff]  ;;  %v230_v14 = vmul.f32 %v222_v8, %v222_v8  ;;  %v216_v15 = vsel %vm215_vm0, %v214_v3, 0.0  ;;  %v247_v16 = vadd.f32 %v233_v7, %v231_v6  ;;  %v232_v17 = vmul.f32 %v224_v11, %v224_v11  ;;  %s463_s7 = scalar_lea.sflag [#allocation4], %s1011_s27  ;;  %s764_s30 = scalar_lea.vmem %s483_s4, 256 }
  0x4d   : > { %v234_v18 = vmul.f32 %v226_v12, %v226_v12  ;;  %416 = vmatpush1.xpose.msra.mxu1 %v228_v13  ;;  %217 = vadd.xlane.f32.xlu0 %v216_v15  ;;  %v236_v20 = vmul.f32 %v228_v13, %v228_v13  ;;  %p765_p12 = scmp.ne.s32.totalorder %s483_s4, %s764_s30  ;;  %p1122_p1 = scmp.ne.s32.totalorder %s1112_s24, 0 }
  0x4e   : > { %417 = vmatprep.subr.mxu1 %v227_v4  ;;  %v248_v19 = vadd.f32 %v247_v16, %v235_v9  ;;  %v238_v21 = vadd.f32 %v232_v17, %v230_v14  ;;  %s869_s8 = smov [#allocation7]  }
  0x4f   : > { %p766_p7 = pnand %p765_p12, %p1122_p1  ;;  %s768_s9 = sshll.u32 %s869_s8, 4  ;;  %s769_s9 = int_to_ptr.vmem [resolvable:$false] %s768_s9 }
  0x50   : > { %v249_v22 = vadd.f32 %v248_v19, %v237_v10  ;;  %v239_v23 = vadd.f32 %v238_v21, %v234_v18  ;;  %s770_s10 = scalar_lea.vmem %s769_s9, 512  ;;  %p771_p9 = scmp.lt.s32.totalorder %s483_s4, %s769_s9 }
  0x51   : > { %418 = vmatpush1.xpose.msra.mxu1 %v226_v12  ;;  %p767_p8 = pneg %p766_p7  ;;  %p772_p10 = scmp.lt.s32.totalorder %s770_s10, %s764_s30 }
  0x52   : > { %419 = vmatprep.subr.mxu1 %v225_v2  ;;  %v250_v24 = vrot.slane %v249_v22, 4  ;;  %v240_v25 = vadd.f32 %v239_v23, %v236_v20 }
  0x53   : > { %p773_p2 = por %p772_p10, %p771_p9 }
  0x54   : > { %v251_v26 = vadd.f32 %v250_v24, %v249_v22  ;;  %v241_v27 = vrot.slane %v240_v25, 4 }
  0x55   : > { %420 = vmatpush1.xpose.msra.mxu1 %v224_v11  ;;  %p774_p0 = pnand %p773_p2, %p767_p8 }
  0x56   : > { %421 = vmatprep.subr.mxu1 %v223_v1  ;;  %v252_v28 = vrot.slane %v251_v26, 2  ;;  %v242_v29 = vadd.f32 %v241_v27, %v240_v25 }
  0x58   : > { %v253_v30 = vadd.f32 %v252_v28, %v251_v26  ;;  %v243_v31 = vrot.slane %v242_v29, 2 }
  0x59   : > { %422 = vmatpush1.xpose.msra.mxu1 %v222_v8 }
  0x5a   : > { %v254_v32 = vrot.slane %v253_v30, 1  ;;  %v244_v33 = vadd.f32 %v243_v31, %v242_v29 }
  0x5c   : > { %v255_v35 = vadd.f32 %v254_v32, %v253_v30  ;;  %v245_v36 = vrot.slane %v244_v33, 1 }
  0x5e   : > { %v257_v37 = vmax.f32 %v255_v35, 1e-24  ;;  %v246_v38 = vadd.f32 %v245_v36, %v244_v33 }
  0x60   : > { %694 = vrsqrt.f32 %v257_v37  ;;  %v256_v39 = vmax.f32 %v246_v38, 1e-24 }
  0x62   : > { %696 = vrsqrt.f32 %v256_v39 }
  0x6d   : > { %v695_v40 = vpop.eup %694 }
  0x6e   : > { %v267_v41 = vmul.f32 %v695_v40, %v229_v5  ;;  %v265_v43 = vmul.f32 %v695_v40, %v227_v4  ;;  %v263_v46 = vmul.f32 %v695_v40, %v225_v2  ;;  %v261_v48 = vmul.f32 %v695_v40, %v223_v1 }
  0x6f   : > { %v697_v42 = vpop.eup %696 }
  0x70   : > { %295 = vmatprep.subr.mxu0 %v267_v41  ;;  %v266_v44 = vmul.f32 %v697_v42, %v228_v13  ;;  %v264_v45 = vmul.f32 %v697_v42, %v226_v12  ;;  %v262_v47 = vmul.f32 %v697_v42, %v224_v11  ;;  %v260_v49 = vmul.f32 %v697_v42, %v222_v8 }
  0x72   : > { %296 = vmatpush1.msra.mxu0 %v266_v44 }
  0x73   : > { %297 = vmatprep.subr.mxu0 %v265_v43 }
  0x74   : > { %298 = vmatpush1.msra.mxu0 %v264_v45 }
  0x75   : > { %299 = vmatprep.subr.mxu0 %v263_v46 }
  0x76   : > { %300 = vmatpush1.msra.mxu0 %v262_v47 }
  0x77   : > { %301 = vmatprep.subr.mxu0 %v261_v48 }
  0x78   : > { %302 = vmatpush1.msra.mxu0 %v260_v49 }
  0xd6   : > { %v218_v50 = vpop.xlane.xlu0 %217 }
  0xd7   : > { %v219_v51 = vmax.f32 %v218_v50, 1e-24 }
  0xd9   : > { %698 = vrsqrt.f32 %v219_v51 }
  0xe6   : > { %v699_v52 = vpop.eup %698 }
  0xe7   : > { %v221_v53 = vmul.f32 %v699_v52, %v1023_v0 }
  0xe9   : > { %619 = vmatmul.mubr.msk.f32.vlgmr.msra.gmra.mxu0 %vm215_vm0, %v221_v53 }
 0x1a9   : > { %v337_v54 = vpop.f32.mrf.mxu0 }
 0x1aa   : > { %342 = vst [vmem:[%s1031_s26] sm:$0xff] %v337_v54  ;;  %v344_v55 = vmul.f32 14.285714, %v337_v54 }
 0x1ab   : > { %v339_v56 = vpop.f32.mrf.mxu0 }
 0x1ac   : > { %v346_v57 = vrot.slane %v344_v55, 4  ;;  %343 = vst [vmem:[%s1031_s26 + $0x8] sm:$0xff] %v339_v56  ;;  %v345_v58 = vmul.f32 14.285714, %v339_v56 }
 0x1ae   : > { %v347_v59 = vmax.f32 %v344_v55, %v346_v57  ;;  %v352_v60 = vrot.slane %v345_v58, 4 }
 0x1b0   : > { %v348_v61 = vrot.slane %v347_v59, 2  ;;  %v353_v62 = vmax.f32 %v345_v58, %v352_v60 }
 0x1b2   : > { %v349_v63 = vmax.f32 %v347_v59, %v348_v61  ;;  %v354_v0 = vrot.slane %v353_v62, 2 }
 0x1b4   : > { %v350_v1 = vrot.slane %v349_v63, 1  ;;  %v355_v2 = vmax.f32 %v353_v62, %v354_v0 }
 0x1b6   : > { %v351_v3 = vmax.f32 %v349_v63, %v350_v1  ;;  %v356_v4 = vrot.slane %v355_v2, 1 }
 0x1b8   : > { %v358_v5 = vsub.f32 %v344_v55, %v351_v3  ;;  %v357_v6 = vmax.f32 %v355_v2, %v356_v4 }
 0x1ba   : > { %v360_v7 = vmul.f32 1.442695, %v358_v5  ;;  %v359_v8 = vsub.f32 %v345_v58, %v357_v6 }
 0x1bc   : > { %700 = vpow2.f32 %v360_v7  ;;  %v362_v9 = vmul.f32 1.442695, %v359_v8 }
 0x1be   : > { %702 = vpow2.f32 %v362_v9 }
 0x1c9   : > { %v701_v10 = vpop.eup %700 }
 0x1ca   : > { %v364_v11 = vrot.slane %v701_v10, 4 }
 0x1cb   : > { %v703_v12 = vpop.eup %702 }
 0x1cc   : > { %v365_v13 = vadd.f32 %v701_v10, %v364_v11  ;;  %v370_v14 = vrot.slane %v703_v12, 4 }
 0x1ce   : > { %v366_v15 = vrot.slane %v365_v13, 2  ;;  %v371_v16 = vadd.f32 %v703_v12, %v370_v14 }
 0x1d0   : > { %v367_v17 = vadd.f32 %v366_v15, %v365_v13  ;;  %v372_v18 = vrot.slane %v371_v16, 2 }
 0x1d2   : > { %v368_v19 = vrot.slane %v367_v17, 1  ;;  %v373_v20 = vadd.f32 %v372_v18, %v371_v16 }
 0x1d4   : > { %v369_v21 = vadd.f32 %v368_v19, %v367_v17  ;;  %v374_v22 = vrot.slane %v373_v20, 1 }
 0x1d6   : > { %v375_v23 = vadd.f32 %v374_v22, %v373_v20  ;;  %704 = vrcp.f32 %v369_v21 }
 0x1d8   : > { %706 = vrcp.f32 %v375_v23 }
 0x1e3   : > { %v705_v24 = vpop.eup %704 }
 0x1e4   : > { %v380_v25 = vmul.f32 %v705_v24, %v701_v10 }
 0x1e5   : > { %v707_v26 = vpop.eup %706 }
 0x1e6   : > { %v381_v27 = vmul.f32 %v707_v26, %v703_v12  ;;  %v382_v28 = vadd.f32 1e-06, %v380_v25 }
 0x1e8   : > { %v383_v29 = vadd.f32 1e-06, %v381_v27 }
 0x1ea   : > { %v384_v30 = vadd.f32 %v383_v29, %v382_v28 }
 0x1ec   : > { %385 = vadd.xlane.f32.xlu0 %v384_v30 }
 0x275   : > { %v386_v31 = vpop.xlane.xlu0 %385 }
 0x276   : > { %708 = vrcp.f32 %v386_v31 }
 0x283   : > { %v709_v32 = vpop.eup %708 }
 0x284   : > { %v390_v33 = vmul.f32 %v709_v32, %v383_v29  ;;  %v389_v34 = vmul.f32 %v709_v32, %v382_v28 }
 0x286   : > { %455 = vmatprep.mubr.f32.mxu1 %v390_v33 }
 0x287   : > { %456 = vmatmul.mubr.f32.vlgmr.msra.gmra.mxu1 %v389_v34 }
 0x288   : > { %777 = shalt.err (!%p774_p0)
}
 0x289   : > { %s778_s17 = scalar_lea.hbm %s480_s6, 256  ;;  %s782_s29 = scalar_lea.hbm %s1104_s2, 512 }
 0x28a   : > { %p779_p4 = scmp.ne.s32.totalorder %s480_s6, %s778_s17  ;;  %p783_p6 = scmp.lt.s32.totalorder %s480_s6, %s1104_s2 }
 0x28b   : > { %p784_p13 = scmp.lt.s32.totalorder %s782_s29, %s778_s17 }
 0x28c   : > { %p780_p11 = pnand %p779_p4, %p1122_p1 }
 0x28d   : > { %p785_p3 = por %p784_p13, %p783_p6 }
 0x28e   : > { %p781_p5 = pneg %p780_p11 }
 0x290   : > { %p786_p12 = pnand %p785_p3, %p781_p5 }
 0x292   : > { %789 = shalt.err (!%p786_p12)
}
 0x293   : > { %635 = dma.vmem_to_hbm [thread:$0]  (%p1122_p1), %s483_s4, 256, %s480_s6, %s463_s7  }
 0x294   : > { %s618_s26 = sshll.u32 %s1011_s27, 3  ;;  %s624_s11 = sshll.u32 %s912_s16, 7 }
 0x295   : > { %s212_s20 = scalar_lea.vmem [#allocation8], %s618_s26  ;;  %s1058_s9 = scalar_lea.hbm %s1105_s3, %s624_s11 }
 0x296   : > { %s495_s22 = sshll.u32 %s212_s20, 4  ;;  %s468_s10 = scalar_lea.sflag [#allocation9], %s1011_s27  ;;  %s1060_s22 = int_to_ptr.vmem [resolvable:$true] %s495_s22 }
 0x297   : > { %s790_s4 = scalar_lea.vmem %s1060_s22, 128  ;;  %s870_s16 = smov [#allocation8]  }
 0x298   : > { %p791_p7 = scmp.ne.s32.totalorder %s1060_s22, %s790_s4  ;;  %s794_s6 = sshll.u32 %s870_s16, 4  ;;  %s795_s6 = int_to_ptr.vmem [resolvable:$false] %s794_s6 }
 0x299   : > { %s796_s7 = scalar_lea.vmem %s795_s6, 256  ;;  %p797_p10 = scmp.lt.s32.totalorder %s1060_s22, %s795_s6 }
 0x29a   : > { %p792_p8 = pnand %p791_p7, %p1122_p1  ;;  %p798_p2 = scmp.lt.s32.totalorder %s796_s7, %s790_s4 }
 0x29c   : > { %p793_p9 = pneg %p792_p8  ;;  %p799_p0 = por %p798_p2, %p797_p10 }
 0x29e   : > { %p800_p4 = pnand %p799_p0, %p793_p9 }
 0x347   : > { %v457_v35 = vpop.f32.mrf.mxu1 }
 0x348   : > { %461 = vst.msk [vmem:[%s212_s20] sm:$0xff] %vm215_vm0, %v457_v35 }
 0x349   : > { %v459_v36 = vpop.f32.mrf.mxu1 }
 0x34a   : > { %803 = shalt.err (!%p800_p4)
}
 0x34b   : > { %s804_s17 = scalar_lea.hbm %s1058_s9, 128  ;;  %s808_s28 = scalar_lea.hbm %s1105_s3, 256 }
 0x34c   : > { %p805_p11 = scmp.ne.s32.totalorder %s1058_s9, %s804_s17  ;;  %p809_p13 = scmp.lt.s32.totalorder %s1058_s9, %s1105_s3 }
 0x34d   : > { %p810_p3 = scmp.lt.s32.totalorder %s808_s28, %s804_s17 }
 0x34e   : > { %p806_p5 = pnand %p805_p11, %p1122_p1 }
 0x34f   : > { %p811_p12 = por %p810_p3, %p809_p13 }
 0x350   : > { %p807_p6 = pneg %p806_p5 }
 0x352   : > { %p812_p7 = pnand %p811_p12, %p807_p6 }
 0x354   : > { %815 = shalt.err (!%p812_p7)
}
 0x355   : > { %636 = dma.vmem_to_hbm [thread:$0]  (%p1122_p1), %s1060_s22, 128, %s1058_s9, %s468_s10  }
 0x356 PF: > { %s507_s23 = sand.u32 1, %s850_s12   ;;  %p1123_p8 = scmp.ne.s32.totalorder %s1113_s25, 0 }
 0x357   : > { %p1124_p9 = scmp.ge.s32.totalorder %s862_s15, 2  ;;  %s508_s26 = scalar_lea.sflag [#allocation4], %s507_s23 }
 0x359   : > { %p648_p10 = pnand %p1124_p9, %p1123_p8 }
 0x35b   : > { %p649_p2 = pneg %p648_p10 }
 0x35d   : > { %841 = dma.done.wait (%p649_p2), %s508_s26, 256  }
 0x35e   : > { %843 = vsyncadd (%p649_p2), %s508_s26, 4294967040  ;;  %s517_s11 = scalar_lea.sflag [#allocation9], %s507_s23 }
 0x35f   : > { %845 = dma.done.wait (%p649_p2), %s517_s11, 128  }
 0x360   : > { %847 = vsyncadd (%p649_p2), %s517_s11, 4294967168  ;;  %p21_p1 = scmp.ge.s32.totalorder %s916_s18, 4   ;;  %s1125_s12 = smov %s854_s13 }
 0x361   : > { %s1126_s13 = smov %s858_s14  ;;  %s1127_s14 = smov %s928_s21 }
 0x362   : > { %s1128_s15 = smov %s916_s18  ;;  %23 = sbr.rel (!%p21_p1) target bundleno = 8 (0x8), region = 94 }
 0x367   :  { %522 = vsyncpa [#allocation3], 1 }
 0x368   :  { %524 = vsyncpa [#allocation3 + $0x1], 1 }
 0x369   :  { %525 = vsyncpa [#allocation6], 1 }
 0x36a   :  { %526 = vsyncpa [#allocation4], 1 }
 0x36b   :  { %528 = vsyncpa [#allocation4 + $0x1], 1 }
 0x36c   :  { %529 = vsyncpa [#allocation9], 1 }
 0x36d   :  { %531 = vsyncpa [#allocation9 + $0x1], 1 }

</bundles_post_ra>
